<compile_context>
chip_gen: v5e
topology: v5e:2x2
jax: 0.10.0
libtpu: 0.0.40
codegen_flags: <defaults>
</compile_context>

<pallas_src>
import math

import jax
import jax.numpy as jnp
from jax.experimental import pallas as pl
from jax.experimental.pallas import tpu as pltpu


def _round_up(x, m):
    return ((x + m - 1) // m) * m


def _vmem_cap_bytes():
    """~80% of this generation's physical VMEM; conservative fallback (v7x-safe)."""
    try:
        return int(0.8 * pltpu.get_tpu_info().vmem_capacity_bytes)
    except Exception:
        return 48 * 1024 * 1024


def _make_kernel(lane_packed, H):
    def kernel(
        x_ref,      # (TN, H)                 compute dtype
        v_ref,      # (TN, 3H) or (3, TN, H)  compute dtype
        w1_ref,     # (H, H)   vec1_proj
        w2_ref,     # (H, O)   vec2_proj
        wu1x_ref,   # (H, I)   update_net[0] rows for x
        wu1v_ref,   # (H, I)   update_net[0] rows for vec1
        bu1_ref,    # (1, I)   f32
        wu2x_ref,   # (I, O)   update_net[2] cols -> scalar output
        bu2x_ref,   # (1, O)   f32
        wu2g_ref,   # (I, O)   update_net[2] cols -> vector gate
        bu2g_ref,   # (1, O)   f32
        xo_ref,     # (TN, O)
        vo_ref,     # (TN, 3O) lane-packed vector output
    ):
        x = x_ref[...]
        w1 = w1_ref[...]
        w2 = w2_ref[...]

        if lane_packed:
            # (TN, 3H) with H % 128 == 0: lane-aligned component slices, near-free.
            vs = [v_ref[:, a * H:(a + 1) * H] for a in range(3)]
            sq = None
            for a in range(3):
                p = jnp.dot(vs[a], w1, preferred_element_type=jnp.float32)
                sq = p * p if sq is None else sq + p * p
        else:
            # (3, TN, H) -> (3TN, H): free reshape (TN % 8 == 0). One MXU weight
            # push for w1 instead of three.
            tn = v_ref.shape[1]
            v3 = v_ref[...].reshape(3 * tn, H)
            p = jnp.dot(v3, w1, preferred_element_type=jnp.float32)
            p2 = p * p
            sq = p2[0:tn] + p2[tn:2 * tn] + p2[2 * tn:3 * tn]

        # TODO(synk): forward matches PyTorch exactly (no eps); add an epsilon if this
        # kernel is ever differentiated (grad of sqrt at 0 is inf).
        vec1 = jnp.sqrt(sq)                                   # (TN, H) f32

        # update_net( cat([x, vec1], -1) ) without the lane concat.
        # Note: with bf16 compute dtype vec1/h are re-cast before the MXU; keep these
        # two matmuls in f32 if gate accuracy ever matters more than MXU rate.
        h = (
            jnp.dot(x, wu1x_ref[...], preferred_element_type=jnp.float32)
            + jnp.dot(vec1.astype(wu1v_ref.dtype), wu1v_ref[...],
                      preferred_element_type=jnp.float32)
            + bu1_ref[...]
        )
        h = h * jax.nn.sigmoid(h)                             # SiLU in f32

        hc = h.astype(wu2x_ref.dtype)
        x_out = jnp.dot(hc, wu2x_ref[...],
                        preferred_element_type=jnp.float32) + bu2x_ref[...]
        gate = jnp.dot(hc, wu2g_ref[...],
                       preferred_element_type=jnp.float32) + bu2g_ref[...]
        xo_ref[...] = x_out.astype(xo_ref.dtype)              # scalar_activation=False

        # vec2 (w2 projection) deferred until AFTER the gate: short-lived intermediates.
        if lane_packed:
            gated = [gate * jnp.dot(vs[a], w2, preferred_element_type=jnp.float32)
                     for a in range(3)]
        else:
            vec2 = jnp.dot(v3, w2, preferred_element_type=jnp.float32)   # (3TN, O)
            gated = [gate * vec2[a * tn:(a + 1) * tn] for a in range(3)]

        # Lane-packed (TN, 3O) store -> wrapper reshape to (N, 3, O) is free.
        vo_ref[...] = jnp.concatenate(gated, axis=-1).astype(vo_ref.dtype)

    return kernel


def prepare_params(params, hidden_channels, out_channels, compute_dtype=jnp.float32):
    """Hoisted per-model preprocessing: split/cast weights ONCE (not per call)."""
    H, O = hidden_channels, out_channels
    cdt = compute_dtype
    bu1 = params["bu1"].reshape(1, -1).astype(jnp.float32)
    bu2 = params["bu2"].reshape(1, -1).astype(jnp.float32)
    return {
        "w1": params["w1"].astype(cdt),            # (H, H)
        "w2": params["w2"].astype(cdt),            # (H, O)
        "wu1x": params["wu1"][:H].astype(cdt),     # (H, I)  removes in-kernel concat
        "wu1v": params["wu1"][H:].astype(cdt),     # (H, I)
        "bu1": bu1,                                # (1, I)
        "wu2x": params["wu2"][:, :O].astype(cdt),  # (I, O)  removes in-kernel slice
        "wu2g": params["wu2"][:, O:].astype(cdt),  # (I, O)
        "bu2x": bu2[:, :O],                        # (1, O)
        "bu2g": bu2[:, O:],                        # (1, O)
    }


def gated_equivariant_block(x, v, prep, *, tile_n=512):
    """x: (N, H), v: (N, 3, H), prep from prepare_params. Returns (x_out, v_out)."""
    N, H = x.shape
    assert v.shape == (N, 3, H)
    O = prep["w2"].shape[1]
    I = prep["wu1x"].shape[1]
    cdt = prep["w1"].dtype
    out_dtype = x.dtype
    itemsize = jnp.dtype(cdt).itemsize
    out_isz = jnp.dtype(out_dtype).itemsize

    lane_packed = (H % 128 == 0)
    xk = x.astype(cdt)
    if lane_packed:
        # Free reshape: no HBM transpose pass over the largest operand.
        vk = v.reshape(N, 3 * H).astype(cdt)
    else:
        # TODO(synk): for H % 128 != 0 this transpose is one extra HBM pass over v.
        vk = jnp.transpose(v, (1, 0, 2)).astype(cdt)          # (3, N, H)

    # Node tiling: multiple of the packed-sublane count for the compute dtype,
    # clamped to the problem, and to >= 2 grid steps (v7x megacore) when possible.
    sub = max(8, 32 // itemsize)                              # 8 f32, 16 bf16, 32 int8
    tile_n = max(sub, min(int(tile_n), _round_up(N, sub)))
    half = _round_up(max(1, -(-N // 2)), sub)
    tile_n = max(sub, min(tile_n, half))
    tile_n = _round_up(tile_n, sub)

    # Generation-aware VMEM budget; shrink tile_n if the estimate does not fit.
    def vmem_need(tn):
        io_tiles = 2 * tn * (4 * H * itemsize + 4 * O * out_isz)   # dbl-buffered x,v,xo,vo
        weights = (H * H + H * O + 2 * H * I + 2 * I * O) * itemsize + (I + 2 * O) * 4
        interm = tn * (4 * H + I + 8 * O) * 4                      # f32 temporaries
        return io_tiles + 2 * weights + interm + (4 << 20)

    vmem_limit = _vmem_cap_bytes()
    while tile_n > sub and vmem_need(tile_n) > vmem_limit:
        tile_n = max(sub, _round_up(tile_n // 2, sub))

    Np = _round_up(N, tile_n)
    if Np != N:
        xk = jnp.pad(xk, ((0, Np - N), (0, 0)))
        if lane_packed:
            vk = jnp.pad(vk, ((0, Np - N), (0, 0)))
        else:
            vk = jnp.pad(vk, ((0, 0), (0, Np - N), (0, 0)))
    grid = (Np // tile_n,)

    full = lambda a: pl.BlockSpec(a.shape, lambda i: (0,) * a.ndim)
    if lane_packed:
        v_spec = pl.BlockSpec((tile_n, 3 * H), lambda i: (i, 0))
    else:
        v_spec = pl.BlockSpec((3, tile_n, H), lambda i: (0, i, 0))

    x_out, v_slab = pl.pallas_call(
        _make_kernel(lane_packed, H),
        out_shape=(
            jax.ShapeDtypeStruct((Np, O), out_dtype),
            jax.ShapeDtypeStruct((Np, 3 * O), out_dtype),
        ),
        grid=grid,
        in_specs=[
            pl.BlockSpec((tile_n, H), lambda i: (i, 0)),      # x
            v_spec,                                            # v
            full(prep["w1"]), full(prep["w2"]),
            full(prep["wu1x"]), full(prep["wu1v"]), full(prep["bu1"]),
            full(prep["wu2x"]), full(prep["bu2x"]),
            full(prep["wu2g"]), full(prep["bu2g"]),
        ],
        out_specs=(
            pl.BlockSpec((tile_n, O), lambda i: (i, 0)),
            pl.BlockSpec((tile_n, 3 * O), lambda i: (i, 0)),
        ),
        compiler_params=pltpu.CompilerParams(
            dimension_semantics=("parallel",),
            vmem_limit_bytes=int(vmem_limit),
        ),
    )(xk, vk, prep["w1"], prep["w2"], prep["wu1x"], prep["wu1v"], prep["bu1"],
      prep["wu2x"], prep["bu2x"], prep["wu2g"], prep["bu2g"])

    x_out = x_out[:N]
    v_out = v_slab[:N].reshape(N, 3, O)     # free contiguous reshape (no transpose)
    return x_out, v_out


# ----------------------------- init + pure-JAX reference -----------------------------

def _xavier_uniform(key, fan_in, fan_out):
    # matches nn.init.xavier_uniform_ on a torch (out, in) weight; returned transposed
    # (in, out) for right-multiplication.
    bound = math.sqrt(6.0 / (fan_in + fan_out))
    return jax.random.uniform(key, (fan_in, fan_out), jnp.float32, -bound, bound)


def init_params(key, hidden_channels, out_channels, intermediate_channels=None):
    if intermediate_channels is None:
        intermediate_channels = hidden_channels
    H, O, I = hidden_channels, out_channels, intermediate_channels
    k1, k2, k3, k4 = jax.random.split(key, 4)
    return {
        "w1": _xavier_uniform(k1, H, H),            # vec1_proj (bias=False)
        "w2": _xavier_uniform(k2, H, O),            # vec2_proj (bias=False)
        "wu1": _xavier_uniform(k3, 2 * H, I),       # update_net[0]
        "bu1": jnp.zeros((1, I), jnp.float32),      # update_net[0].bias (zeros)
        "wu2": _xavier_uniform(k4, I, 2 * O),       # update_net[2]
        "bu2": jnp.zeros((1, 2 * O), jnp.float32),  # update_net[2].bias (zeros)
    }


def reference_forward(x, v, params):
    """Pure-JAX reference mirroring the PyTorch forward."""
    vec1 = jnp.linalg.norm(jnp.einsum("nah,hk->nak", v, params["w1"]), axis=-2)
    vec2 = jnp.einsum("nah,hk->nak", v, params["w2"])
    xc = jnp.concatenate([x, vec1], axis=-1)
    h = jax.nn.silu(xc @ params["wu1"] + params["bu1"])
    out = h @ params["wu2"] + params["bu2"]
    O = params["w2"].shape[1]
    x_out, v_gate = out[:, :O], out[:, O:]
    v_out = v_gate[:, None, :] * vec2
    return x_out, v_out


if __name__ == "__main__":
    # Case 1: H % 128 != 0 -> spatial-leading path, batched (3TN,H) matmuls, row padding.
    N, H, O = 60, 32, 16
    kx, kv, kp = jax.random.split(jax.random.PRNGKey(0), 3)
    x = jax.random.normal(kx, (N, H), jnp.float32)
    v = jax.random.normal(kv, (N, 3, H), jnp.float32)
    params = init_params(kp, H, O)
    x_ref, v_ref = reference_forward(x, v, params)

    prep32 = prepare_params(params, H, O)                       # hoisted, done once
    x_out, v_out = gated_equivariant_block(x, v, prep32)
    jax.block_until_ready((x_out, v_out))
    assert x_out.shape == (N, O) and v_out.shape == (N, 3, O)
    assert jnp.allclose(x_out, x_ref, atol=1e-4, rtol=1e-4)
    assert jnp.allclose(v_out, v_ref, atol=1e-4, rtol=1e-4)

    # bf16 matmul operands (f32 accumulation / f32 elementwise): loose check.
    prep_bf = prepare_params(params, H, O, compute_dtype=jnp.bfloat16)
    x_bf, v_bf = gated_equivariant_block(x, v, prep_bf)
    jax.block_until_ready((x_bf, v_bf))
    assert jnp.allclose(x_bf, x_ref, atol=2e-1, rtol=5e-2)
    assert jnp.allclose(v_bf, v_ref, atol=2e-1, rtol=5e-2)

    # Case 2: H % 128 == 0 -> lane-packed vector input (no HBM transpose pass).
    # Loose-ish tolerance: the pure-JAX reference follows XLA's default f32 matmul
    # precision, which may differ slightly from the kernel's f32 MXU accumulation.
    N2, H2, O2 = 70, 128, 128
    kx2, kv2, kp2 = jax.random.split(jax.random.PRNGKey(1), 3)
    x2 = jax.random.normal(kx2, (N2, H2), jnp.float32)
    v2 = jax.random.normal(kv2, (N2, 3, H2), jnp.float32)
    params2 = init_params(kp2, H2, O2)
    x2_ref, v2_ref = reference_forward(x2, v2, params2)
    prep2 = prepare_params(params2, H2, O2)
    x2_out, v2_out = gated_equivariant_block(x2, v2, prep2)
    jax.block_until_ready((x2_out, v2_out))
    assert x2_out.shape == (N2, O2) and v2_out.shape == (N2, 3, O2)
    assert jnp.allclose(x2_out, x2_ref, atol=3e-2, rtol=3e-2)
    assert jnp.allclose(v2_out, v2_ref, atol=3e-2, rtol=3e-2)

    print("KERNEL_OK")
</pallas_src>

<mosaic_0001>
module attributes {stable_mosaic.version = 11 : i64} {
  func.func @kernel(%arg0: i32, %arg1: memref<32x32xf32, #tpu.memory_space<vmem>>, %arg2: memref<3x32x32xf32, #tpu.memory_space<vmem>>, %arg3: memref<32x32xf32, #tpu.memory_space<vmem>>, %arg4: memref<32x16xf32, #tpu.memory_space<vmem>>, %arg5: memref<32x32xf32, #tpu.memory_space<vmem>>, %arg6: memref<32x32xf32, #tpu.memory_space<vmem>>, %arg7: memref<1x32xf32, #tpu.memory_space<vmem>>, %arg8: memref<32x16xf32, #tpu.memory_space<vmem>>, %arg9: memref<1x16xf32, #tpu.memory_space<vmem>>, %arg10: memref<32x16xf32, #tpu.memory_space<vmem>>, %arg11: memref<1x16xf32, #tpu.memory_space<vmem>>, %arg12: memref<32x16xf32, #tpu.memory_space<vmem>>, %arg13: memref<32x48xf32, #tpu.memory_space<vmem>>) attributes {dimension_semantics = [#tpu.dimension_semantics<parallel>], iteration_bounds = array<i64: 2>, scalar_prefetch = 0 : i64, scratch_operands = 0 : i64, tpu.core_type = #tpu.core_type<tc>, window_params = [{transform_indices = @transform_0, window_bounds = array<i64: 32, 32>}, {transform_indices = @transform_1, window_bounds = array<i64: 3, 32, 32>}, {pipeline_mode = #tpu.pipeline_mode<synchronous>, transform_indices = @transform_2, window_bounds = array<i64: 32, 32>}, {pipeline_mode = #tpu.pipeline_mode<synchronous>, transform_indices = @transform_3, window_bounds = array<i64: 32, 16>}, {pipeline_mode = #tpu.pipeline_mode<synchronous>, transform_indices = @transform_4, window_bounds = array<i64: 32, 32>}, {pipeline_mode = #tpu.pipeline_mode<synchronous>, transform_indices = @transform_5, window_bounds = array<i64: 32, 32>}, {pipeline_mode = #tpu.pipeline_mode<synchronous>, transform_indices = @transform_6, window_bounds = array<i64: 1, 32>}, {pipeline_mode = #tpu.pipeline_mode<synchronous>, transform_indices = @transform_7, window_bounds = array<i64: 32, 16>}, {pipeline_mode = #tpu.pipeline_mode<synchronous>, transform_indices = @transform_8, window_bounds = array<i64: 1, 16>}, {pipeline_mode = #tpu.pipeline_mode<synchronous>, transform_indices = @transform_9, window_bounds = array<i64: 32, 16>}, {pipeline_mode = #tpu.pipeline_mode<synchronous>, transform_indices = @transform_10, window_bounds = array<i64: 1, 16>}, {transform_indices = @transform_11, window_bounds = array<i64: 32, 16>}, {transform_indices = @transform_12, window_bounds = array<i64: 32, 48>}]} {
    %c0 = arith.constant 0 : index
    %c0_0 = arith.constant 0 : index
    %0 = vector.load %arg1[%c0, %c0_0] : memref<32x32xf32, #tpu.memory_space<vmem>>, vector<32x32xf32>
    %c0_1 = arith.constant 0 : index
    %c0_2 = arith.constant 0 : index
    %1 = vector.load %arg3[%c0_1, %c0_2] : memref<32x32xf32, #tpu.memory_space<vmem>>, vector<32x32xf32>
    %c0_3 = arith.constant 0 : index
    %c0_4 = arith.constant 0 : index
    %2 = vector.load %arg4[%c0_3, %c0_4] : memref<32x16xf32, #tpu.memory_space<vmem>>, vector<32x16xf32>
    %c0_5 = arith.constant 0 : index
    %c0_6 = arith.constant 0 : index
    %c0_7 = arith.constant 0 : index
    %3 = vector.load %arg2[%c0_5, %c0_6, %c0_7] : memref<3x32x32xf32, #tpu.memory_space<vmem>>, vector<3x32x32xf32>
    %4 = vector.shape_cast %3 : vector<3x32x32xf32> to vector<96x32xf32>
    %cst = arith.constant dense<0.000000e+00> : vector<96x32xf32>
    %5 = tpu.matmul %4, %1, %cst {dimension_numbers = #tpu.dot_dimension_numbers<[1], [0], [0], [1], [0, 0, 1, 1], [], []>} : vector<96x32xf32>, vector<32x32xf32>, vector<96x32xf32> -> vector<96x32xf32>
    %6 = arith.mulf %5, %5 : vector<96x32xf32>
    %7 = vector.extract_strided_slice %6 {offsets = [0, 0], sizes = [32, 32], strides = [1, 1]} : vector<96x32xf32> to vector<32x32xf32>
    %8 = vector.extract_strided_slice %6 {offsets = [32, 0], sizes = [32, 32], strides = [1, 1]} : vector<96x32xf32> to vector<32x32xf32>
    %9 = arith.addf %7, %8 : vector<32x32xf32>
    %10 = vector.extract_strided_slice %6 {offsets = [64, 0], sizes = [32, 32], strides = [1, 1]} : vector<96x32xf32> to vector<32x32xf32>
    %11 = arith.addf %9, %10 : vector<32x32xf32>
    %12 = math.sqrt %11 : vector<32x32xf32>
    %c0_8 = arith.constant 0 : index
    %c0_9 = arith.constant 0 : index
    %13 = vector.load %arg5[%c0_8, %c0_9] : memref<32x32xf32, #tpu.memory_space<vmem>>, vector<32x32xf32>
    %cst_10 = arith.constant dense<0.000000e+00> : vector<32x32xf32>
    %14 = tpu.matmul %0, %13, %cst_10 {dimension_numbers = #tpu.dot_dimension_numbers<[1], [0], [0], [1], [0, 0, 1, 1], [], []>} : vector<32x32xf32>, vector<32x32xf32>, vector<32x32xf32> -> vector<32x32xf32>
    %c0_11 = arith.constant 0 : index
    %c0_12 = arith.constant 0 : index
    %15 = vector.load %arg6[%c0_11, %c0_12] : memref<32x32xf32, #tpu.memory_space<vmem>>, vector<32x32xf32>
    %cst_13 = arith.constant dense<0.000000e+00> : vector<32x32xf32>
    %16 = tpu.matmul %12, %15, %cst_13 {dimension_numbers = #tpu.dot_dimension_numbers<[1], [0], [0], [1], [0, 0, 1, 1], [], []>} : vector<32x32xf32>, vector<32x32xf32>, vector<32x32xf32> -> vector<32x32xf32>
    %17 = arith.addf %14, %16 : vector<32x32xf32>
    %c0_14 = arith.constant 0 : index
    %c0_15 = arith.constant 0 : index
    %18 = vector.load %arg7[%c0_14, %c0_15] : memref<1x32xf32, #tpu.memory_space<vmem>>, vector<1x32xf32>
    %19 = vector.broadcast %18 : vector<1x32xf32> to vector<32x32xf32>
    %20 = arith.addf %17, %19 : vector<32x32xf32>
    %21 = arith.negf %20 : vector<32x32xf32>
    %22 = math.exp %21 : vector<32x32xf32>
    %cst_16 = arith.constant 1.000000e+00 : f32
    %23 = vector.broadcast %cst_16 : f32 to vector<32x32xf32>
    %24 = arith.addf %23, %22 : vector<32x32xf32>
    %25 = arith.divf %23, %24 : vector<32x32xf32>
    %26 = arith.mulf %20, %25 : vector<32x32xf32>
    %c0_17 = arith.constant 0 : index
    %c0_18 = arith.constant 0 : index
    %27 = vector.load %arg8[%c0_17, %c0_18] : memref<32x16xf32, #tpu.memory_space<vmem>>, vector<32x16xf32>
    %cst_19 = arith.constant dense<0.000000e+00> : vector<32x16xf32>
    %28 = tpu.matmul %26, %27, %cst_19 {dimension_numbers = #tpu.dot_dimension_numbers<[1], [0], [0], [1], [0, 0, 1, 1], [], []>} : vector<32x32xf32>, vector<32x16xf32>, vector<32x16xf32> -> vector<32x16xf32>
    %c0_20 = arith.constant 0 : index
    %c0_21 = arith.constant 0 : index
    %29 = vector.load %arg9[%c0_20, %c0_21] : memref<1x16xf32, #tpu.memory_space<vmem>>, vector<1x16xf32>
    %30 = vector.broadcast %29 : vector<1x16xf32> to vector<32x16xf32>
    %31 = arith.addf %28, %30 : vector<32x16xf32>
    %c0_22 = arith.constant 0 : index
    %c0_23 = arith.constant 0 : index
    %32 = vector.load %arg10[%c0_22, %c0_23] : memref<32x16xf32, #tpu.memory_space<vmem>>, vector<32x16xf32>
    %cst_24 = arith.constant dense<0.000000e+00> : vector<32x16xf32>
    %33 = tpu.matmul %26, %32, %cst_24 {dimension_numbers = #tpu.dot_dimension_numbers<[1], [0], [0], [1], [0, 0, 1, 1], [], []>} : vector<32x32xf32>, vector<32x16xf32>, vector<32x16xf32> -> vector<32x16xf32>
    %c0_25 = arith.constant 0 : index
    %c0_26 = arith.constant 0 : index
    %34 = vector.load %arg11[%c0_25, %c0_26] : memref<1x16xf32, #tpu.memory_space<vmem>>, vector<1x16xf32>
    %35 = vector.broadcast %34 : vector<1x16xf32> to vector<32x16xf32>
    %36 = arith.addf %33, %35 : vector<32x16xf32>
    %c0_27 = arith.constant 0 : index
    %c0_28 = arith.constant 0 : index
    %37 = vector.load %arg12[%c0_27, %c0_28] : memref<32x16xf32, #tpu.memory_space<vmem>>, vector<32x16xf32>
    tpu.vector_store %arg12[%c0_27, %c0_28], %31 {strides = array<i32>} : memref<32x16xf32, #tpu.memory_space<vmem>>, vector<32x16xf32>,
    %cst_29 = arith.constant dense<0.000000e+00> : vector<96x16xf32>
    %38 = tpu.matmul %4, %2, %cst_29 {dimension_numbers = #tpu.dot_dimension_numbers<[1], [0], [0], [1], [0, 0, 1, 1], [], []>} : vector<96x32xf32>, vector<32x16xf32>, vector<96x16xf32> -> vector<96x16xf32>
    %39 = vector.extract_strided_slice %38 {offsets = [0, 0], sizes = [32, 16], strides = [1, 1]} : vector<96x16xf32> to vector<32x16xf32>
    %40 = arith.mulf %36, %39 : vector<32x16xf32>
    %41 = vector.extract_strided_slice %38 {offsets = [32, 0], sizes = [32, 16], strides = [1, 1]} : vector<96x16xf32> to vector<32x16xf32>
    %42 = arith.mulf %36, %41 : vector<32x16xf32>
    %43 = vector.extract_strided_slice %38 {offsets = [64, 0], sizes = [32, 16], strides = [1, 1]} : vector<96x16xf32> to vector<32x16xf32>
    %44 = arith.mulf %36, %43 : vector<32x16xf32>
    %45 = tpu.concatenate %40, %42, %44 in 1 : vector<32x16xf32>, vector<32x16xf32>, vector<32x16xf32> -> vector<32x48xf32>
    %c0_30 = arith.constant 0 : index
    %c0_31 = arith.constant 0 : index
    %46 = vector.load %arg13[%c0_30, %c0_31] : memref<32x48xf32, #tpu.memory_space<vmem>>, vector<32x48xf32>
    tpu.vector_store %arg13[%c0_30, %c0_31], %45 {strides = array<i32>} : memref<32x48xf32, #tpu.memory_space<vmem>>, vector<32x48xf32>,
    return
  }
  func.func @transform_0(%arg0: i32) -> (i32, i32) {
    %c0_i32 = arith.constant 0 : i32
    %c0_i32_0 = arith.constant 0 : i32
    return %arg0, %c0_i32 : i32, i32
  }
  func.func @transform_1(%arg0: i32) -> (i32, i32, i32) {
    %c0_i32 = arith.constant 0 : i32
    %c0_i32_0 = arith.constant 0 : i32
    %c0_i32_1 = arith.constant 0 : i32
    return %c0_i32, %arg0, %c0_i32_0 : i32, i32, i32
  }
  func.func @transform_2(%arg0: i32) -> (i32, i32) {
    %c0_i32 = arith.constant 0 : i32
    %c0_i32_0 = arith.constant 0 : i32
    %c0_i32_1 = arith.constant 0 : i32
    return %c0_i32, %c0_i32_0 : i32, i32
  }
  func.func @transform_3(%arg0: i32) -> (i32, i32) {
    %c0_i32 = arith.constant 0 : i32
    %c0_i32_0 = arith.constant 0 : i32
    %c0_i32_1 = arith.constant 0 : i32
    return %c0_i32, %c0_i32_0 : i32, i32
  }
  func.func @transform_4(%arg0: i32) -> (i32, i32) {
    %c0_i32 = arith.constant 0 : i32
    %c0_i32_0 = arith.constant 0 : i32
    %c0_i32_1 = arith.constant 0 : i32
    return %c0_i32, %c0_i32_0 : i32, i32
  }
  func.func @transform_5(%arg0: i32) -> (i32, i32) {
    %c0_i32 = arith.constant 0 : i32
    %c0_i32_0 = arith.constant 0 : i32
    %c0_i32_1 = arith.constant 0 : i32
    return %c0_i32, %c0_i32_0 : i32, i32
  }
  func.func @transform_6(%arg0: i32) -> (i32, i32) {
    %c0_i32 = arith.constant 0 : i32
    %c0_i32_0 = arith.constant 0 : i32
    %c0_i32_1 = arith.constant 0 : i32
    return %c0_i32, %c0_i32_0 : i32, i32
  }
  func.func @transform_7(%arg0: i32) -> (i32, i32) {
    %c0_i32 = arith.constant 0 : i32
    %c0_i32_0 = arith.constant 0 : i32
    %c0_i32_1 = arith.constant 0 : i32
    return %c0_i32, %c0_i32_0 : i32, i32
  }
  func.func @transform_8(%arg0: i32) -> (i32, i32) {
    %c0_i32 = arith.constant 0 : i32
    %c0_i32_0 = arith.constant 0 : i32
    %c0_i32_1 = arith.constant 0 : i32
    return %c0_i32, %c0_i32_0 : i32, i32
  }
  func.func @transform_9(%arg0: i32) -> (i32, i32) {
    %c0_i32 = arith.constant 0 : i32
    %c0_i32_0 = arith.constant 0 : i32
    %c0_i32_1 = arith.constant 0 : i32
    return %c0_i32, %c0_i32_0 : i32, i32
  }
  func.func @transform_10(%arg0: i32) -> (i32, i32) {
    %c0_i32 = arith.constant 0 : i32
    %c0_i32_0 = arith.constant 0 : i32
    %c0_i32_1 = arith.constant 0 : i32
    return %c0_i32, %c0_i32_0 : i32, i32
  }
  func.func @transform_11(%arg0: i32) -> (i32, i32) {
    %c0_i32 = arith.constant 0 : i32
    %c0_i32_0 = arith.constant 0 : i32
    return %arg0, %c0_i32 : i32, i32
  }
  func.func @transform_12(%arg0: i32) -> (i32, i32) {
    %c0_i32 = arith.constant 0 : i32
    %c0_i32_0 = arith.constant 0 : i32
    return %arg0, %c0_i32 : i32, i32
  }
}

</mosaic_0001>

<bundles_post_ra>
// kernel: tpu_custom_call.1
= control target key start
LH: loop header
LB: loop body
LE: loop exit
PB: predicated region body
PF: predicated region fallthrough
CT: control target
= control target key end

     0   :  { %s1415_s21 = smov 0   ;;  %s1417_s22 = smov 0   ;;  %s1718_s0 = inlined_call_operand.vmem [shape: f32[64,32], index: 0, kind: input, shape index: {}]   ;;  %s1719_s1 = inlined_call_operand.vmem [shape: f32[3,64,32], index: 1, kind: input, shape index: {}]   ;;  %s1720_s2 = inlined_call_operand.vmem [shape: f32[32,32], index: 2, kind: input, shape index: {}]   ;;  %s1721_s3 = inlined_call_operand.vmem [shape: f32[32,16], index: 3, kind: input, shape index: {}]   ;;  %s1722_s4 = inlined_call_operand.vmem [shape: f32[32,32], index: 4, kind: input, shape index: {}]   ;;  %s1723_s5 = inlined_call_operand.vmem [shape: f32[32,32], index: 5, kind: input, shape index: {}]   ;;  %s1724_s6 = inlined_call_operand.vmem [shape: f32[1,32], index: 6, kind: input, shape index: {}]   ;;  %s1725_s7 = inlined_call_operand.vmem [shape: f32[32,16], index: 7, kind: input, shape index: {}]   ;;  %s1726_s8 = inlined_call_operand.vmem [shape: f32[1,16], index: 8, kind: input, shape index: {}]   ;;  %s1727_s9 = inlined_call_operand.vmem [shape: f32[32,16], index: 9, kind: input, shape index: {}]   ;;  %s1728_s10 = inlined_call_operand.vmem [shape: f32[1,16], index: 10, kind: input, shape index: {}]   ;;  %s1729_s11 = inlined_call_operand.vmem [shape: f32[64,16], index: 11, kind: output, shape index: {0}]   ;;  %s1730_s12 = inlined_call_operand.vmem [shape: f32[64,48], index: 12, kind: output, shape index: {1}]  }
   0x1   :  { %s1419_s23 = smov 0  }
   0x2 LB: > { %s1201_s24 = sadd.s32 4294967295, %s1346_s23   ;;  %s1432_s25 = sadd.s32 1, %s1346_s23   ;;  %s1346_s23 = sphi %s1419_s23, %s1733_s23   ;;  %s1342_s22 = sphi %s1417_s22, %s1732_s22   ;;  %s1338_s21 = sphi %s1415_s21, %s1731_s21  }
   0x3   : > { %s53_s26 = ssub.s32 %s1346_s23, %s1432_s25  ;;  %s56_s27 = sadd.s32 1, %s1342_s22 }
   0x4   : > { %p54_p0 = scmp.eq.s32.totalorder %s53_s26, 0  ;;  %p63_p1 = scmp.ne.s32.totalorder %s1342_s22, %s1338_s21 }
   0x5   : > { %p64_p2 = scmp.eq.s32.totalorder %s1346_s23, 0  ;;  %p1204_p4 = scmp.ge.s32.totalorder %s1346_s23, 2 }
   0x6   : > { %s1441_s28 = scalar_select %p54_p0, %s1342_s22, %s56_s27  }
   0x7   : > { %p65_p3 = por %p64_p2, %p63_p1  ;;  %357 = sbr.rel (%p1204_p4) target bundleno = 28 (0x1c), region = 52 }
   0xc   : > { %369 = sbr.rel (!%p65_p3) target bundleno = 28 (0x1c), region = 60  ;;  %s371_s29 = sand.u32 (%p65_p3), 1, %s1342_s22  }
   0xd   : > { %s1260_s30 = sshll.u32 (%p65_p3), %s1346_s23, 5  ;;  %s1269_s13 = smul.u32 (%p65_p3), 96, %s371_s29 }
   0xe   : > { %s376_s16 = scalar_lea.vmem (%p65_p3), %s1719_s1, %s1260_s30 }
   0xf   : > { %v427_v0 = vld [vmem:[%s376_s16] sm:$0xff] (%p65_p3)  ;;  %v429_v1 = vld [vmem:[%s376_s16 + $0x8] sm:$0xff] (%p65_p3)  ;;  %v431_v2 = vld [vmem:[%s376_s16 + $0x10] sm:$0xff] (%p65_p3)  ;;  %s373_s17 = scalar_lea.vmem (%p65_p3), [#allocation2], %s1269_s13 }
  0x10   : > { %428 = vst [vmem:[%s373_s17] sm:$0xff] (%p65_p3), %v427_v0  ;;  %v433_v3 = vld [vmem:[%s376_s16 + $0x18] sm:$0xff] (%p65_p3)  ;;  %v435_v4 = vld [vmem:[%s376_s16 + $0x40] sm:$0xff] (%p65_p3)  ;;  %v437_v5 = vld [vmem:[%s376_s16 + $0x48] sm:$0xff] (%p65_p3) }
  0x11   : > { %430 = vst [vmem:[%s373_s17 + $0x8] sm:$0xff] %v429_v1  ;;  %v439_v6 = vld [vmem:[%s376_s16 + $0x50] sm:$0xff]  ;;  %v441_v7 = vld [vmem:[%s376_s16 + $0x58] sm:$0xff]  ;;  %v443_v8 = vld [vmem:[%s376_s16 + $0x80] sm:$0xff] }
  0x12   : > { %432 = vst [vmem:[%s373_s17 + $0x10] sm:$0xff] %v431_v2  ;;  %v445_v9 = vld [vmem:[%s376_s16 + $0x88] sm:$0xff]  ;;  %v447_v10 = vld [vmem:[%s376_s16 + $0x90] sm:$0xff]  ;;  %v449_v11 = vld [vmem:[%s376_s16 + $0x98] sm:$0xff] }
  0x13   : > { %434 = vst [vmem:[%s373_s17 + $0x18] sm:$0xff] %v433_v3 }
  0x14   : > { %436 = vst [vmem:[%s373_s17 + $0x20] sm:$0xff] %v435_v4 }
  0x15   : > { %438 = vst [vmem:[%s373_s17 + $0x28] sm:$0xff] %v437_v5 }
  0x16   : > { %440 = vst [vmem:[%s373_s17 + $0x30] sm:$0xff] %v439_v6 }
  0x17   : > { %442 = vst [vmem:[%s373_s17 + $0x38] sm:$0xff] %v441_v7 }
  0x18   : > { %444 = vst [vmem:[%s373_s17 + $0x40] sm:$0xff] %v443_v8 }
  0x19   : > { %446 = vst [vmem:[%s373_s17 + $0x48] sm:$0xff] %v445_v9 }
  0x1a   : > { %448 = vst [vmem:[%s373_s17 + $0x50] sm:$0xff] %v447_v10 }
  0x1b   : > { %450 = vst [vmem:[%s373_s17 + $0x58] sm:$0xff] %v449_v11 }
  0x1c PF: > { %p1207_p5 = scmp.ge.s32.totalorder %s1346_s23, 1  ;;  %p455_p6 = scmp.lt.s32.totalorder %s1346_s23, 3 }
  0x1e   : > { %p456_p7 = pnand %p1207_p5, %p455_p6 }
  0x1f   : > { %s462_s27 = sand.u32 (!%p456_p7), 1, %s1338_s21   ;;  %s1208_s21 = sshll.u32 (!%p456_p7), %s1201_s24, 2 }
  0x20   : > { %459 = sbr.rel (%p456_p7) target bundleno = 743 (0x2e7), region = 98  ;;  %p514_p8 = scmp.lt.s32.totalorder (!%p456_p7), %s1208_s21, 7 }
  0x21   : > { %s1270_s29 = smul.u32 (!%p456_p7), 96, %s462_s27  ;;  %s1348_s24 = smov (!%p456_p7), 16  }
  0x22   : > { %s1349_s15 = smov (!%p456_p7), 32  }
  0x23   : > { %s464_s16 = scalar_lea.vmem (!%p456_p7), [#allocation2], %s1270_s29 }
  0x25   : > { %v539_v12 = vld [vmem:[%s1720_s2 + $0x18] sm:$0xff]  ;;  %v538_v13 = vld [vmem:[%s1720_s2 + $0x10] sm:$0xff]  ;;  %v537_v14 = vld [vmem:[%s1720_s2 + $0x8] sm:$0xff]  ;;  %vm556_vm0 = vcmask 261120   ;;  %s1735_s21 = smov (!%p514_p8, %s1208_s21), 7 }
  0x26   : > { %605 = vmatpush.msra.mxu0 %v539_v12  ;;  %1261 = vmatpush.msra.mxu1 %v539_v12  ;;  %v536_v15 = vld [vmem:[%s1720_s2] sm:$0xff]  ;;  %v1468_v17 = vld [vmem:[%s464_s16 + $0x8] sm:$0xff]  ;;  %v1472_v18 = vld [vmem:[%s464_s16 + $0x10] sm:$0xff]  ;;  %s1514_s17 = sshll.u32 %s1735_s21, 3 }
  0x27   : > { %v1464_v16 = vld [vmem:[%s464_s16] sm:$0xff]  ;;  %v1476_v19 = vld [vmem:[%s464_s16 + $0x50] sm:$0xff]  ;;  %v1480_v20 = vld [vmem:[%s464_s16 + $0x18] sm:$0xff]  ;;  %s1538_s18 = scalar_lea.vmem %s1718_s0, %s1514_s17  ;;  %s524_s14 = scalar_lea.vmem %s1729_s11, %s1514_s17 }
  0x28   : > { %606 = vmatpush.msra.mxu0 %v538_v13  ;;  %1262 = vmatpush.msra.mxu1 %v538_v13  ;;  %v1484_v21 = vld [vmem:[%s464_s16 + $0x58] sm:$0xff]  ;;  %v1488_v22 = vld [vmem:[%s464_s16 + $0x20] sm:$0xff]  ;;  %v1492_v23 = vld [vmem:[%s464_s16 + $0x28] sm:$0xff] }
  0x29   : > { %v1496_v24 = vld [vmem:[%s464_s16 + $0x30] sm:$0xff]  ;;  %v1500_v25 = vld [vmem:[%s464_s16 + $0x38] sm:$0xff]  ;;  %v1504_v26 = vld [vmem:[%s464_s16 + $0x40] sm:$0xff] }
  0x2a   : > { %607 = vmatpush.msra.mxu0 %v537_v14  ;;  %1263 = vmatpush.msra.mxu1 %v537_v14  ;;  %v1508_v27 = vld [vmem:[%s464_s16 + $0x48] sm:$0xff]  ;;  %v721_v34 = vld [vmem:[%s1723_s5 + $0x18] sm:$0xff]  ;;  %v720_v36 = vld [vmem:[%s1723_s5 + $0x10] sm:$0xff] }
  0x2b   : > { %v717_v35 = vld [vmem:[%s1722_s4 + $0x18] sm:$0xff]  ;;  %v716_v37 = vld [vmem:[%s1722_s4 + $0x10] sm:$0xff]  ;;  %v715_v38 = vld [vmem:[%s1722_s4 + $0x8] sm:$0xff] }
  0x2c   : > { %608 = vmatpush.msra.mxu0 %v536_v15  ;;  %1264 = vmatpush.msra.mxu1 %v536_v15  ;;  %v719_v39 = vld [vmem:[%s1723_s5 + $0x8] sm:$0xff]  ;;  %v714_v40 = vld [vmem:[%s1722_s4] sm:$0xff]  ;;  %v534_v60 = vld [vmem:[%s1538_s18 + $0x10] sm:$0xff] }
  0x2d   : > { %1214 = vmatmul.msk.f32.vlgmr.msra.gmra.mxu0 %vm556_vm0, %v1464_v16  ;;  %1224 = vmatmul.msk.f32.vlgmr.msra.gmra.mxu1 %vm556_vm0, %v1476_v19  ;;  %v718_v41 = vld [vmem:[%s1723_s5] sm:$0xff]  ;;  %v533_v48 = vld [vmem:[%s1538_s18 + $0x8] sm:$0xff]  ;;  %v535_v7 = vld [vmem:[%s1538_s18 + $0x18] sm:$0xff] }
  0x2e   : > { %746 = vmatpush.msrb.mxu1 %v721_v34  ;;  %787 = vmatpush.msra.mxu2 %v717_v35  ;;  %v532_v43 = vld [vmem:[%s1538_s18] sm:$0xff]  ;;  %v1575_v34 = vld [vmem:[%s1721_s3 + $0x8] sm:$0xff]  ;;  %s530_s18 = scalar_lea.vmem %s1730_s12, %s1514_s17 }
  0x30   : > { %747 = vmatpush.msrb.mxu1 %v720_v36  ;;  %788 = vmatpush.msra.mxu2 %v716_v37 }
  0x32   : > { %789 = vmatpush.msra.mxu2 %v715_v38  ;;  %748 = vmatpush.msrb.mxu1 %v719_v39  ;;  %v1582_v39 = vld [vmem:[%s1721_s3] sm:$0xff] }
  0x34   : > { %790 = vmatpush.msra.mxu2 %v714_v40  ;;  %749 = vmatpush.msrb.mxu1 %v718_v41 }
  0x35   : > { %1215 = vmatmul.msk.f32.gmra.mxu0 %vm556_vm0, %v1468_v17  ;;  %1225 = vmatmul.msk.f32.gmra.mxu1 %vm556_vm0, %v1484_v21 }
  0x36   : > { %1230 = vmatmul.msk.f32.vlgmr.msra.gmra.mxu2 %vm556_vm0, %v532_v43 }
  0x3d   : > { %1216 = vmatmul.msk.f32.gmra.mxu0 %vm556_vm0, %v1472_v18 }
  0x3e   : > { %1231 = vmatmul.msk.f32.gmra.mxu2 %vm556_vm0, %v533_v48 }
  0x45   : > { %1217 = vmatmul.msk.f32.gmra.mxu0 %vm556_vm0, %v1480_v20 }
  0x46   : > { %1232 = vmatmul.msk.f32.gmra.mxu2 %vm556_vm0, %v534_v60 }
  0x4d   : > { %1218 = vmatmul.msk.f32.gmra.mxu0 %vm556_vm0, %v1488_v22 }
  0x4e   : > { %1233 = vmatmul.msk.f32.gmra.mxu2 %vm556_vm0, %v535_v7 }
  0x55   : > { %1219 = vmatmul.msk.f32.gmra.mxu0 %vm556_vm0, %v1492_v23 }
  0x5d   : > { %1220 = vmatmul.msk.f32.gmra.mxu0 %vm556_vm0, %v1496_v24 }
  0x65   : > { %1221 = vmatmul.msk.f32.gmra.mxu0 %vm556_vm0, %v1500_v25 }
  0x6d   : > { %1222 = vmatmul.msk.f32.gmra.mxu0 %vm556_vm0, %v1504_v26 }
  0x75   : > { %1223 = vmatmul.msk.f32.gmra.mxu0 %vm556_vm0, %v1508_v27 }
  0xaa   : > { %v610_v28 = vpop.f32.mrf.mxu0  ;;  %v640_v44 = vpop.f32.mrf.mxu1 }
  0xab   : > { %v656_v50 = vmul.f32 %v640_v44, %v640_v44  ;;  %v646_v52 = vmul.f32 %v610_v28, %v610_v28 }
  0xb2   : > { %v613_v29 = vpop.f32.mrf.mxu0  ;;  %v643_v57 = vpop.f32.mrf.mxu1 }
  0xb3   : > { %v657_v63 = vmul.f32 %v643_v57, %v643_v57  ;;  %v647_v1 = vmul.f32 %v613_v29, %v613_v29  ;;  %v1564_v29 = vld [vmem:[%s1721_s3 + $0x18] sm:$0xff] }
  0xb4   : > { %995 = vmatpush.msrb.mxu2 %v1564_v29 }
  0xba   : > { %v616_v30 = vpop.f32.mrf.mxu0 }
  0xbb   : > { %v648_v47 = vmul.f32 %v616_v30, %v616_v30  ;;  %v1569_v30 = vld [vmem:[%s1721_s3 + $0x10] sm:$0xff] }
  0xbc   : > { %996 = vmatpush.msrb.mxu2 %v1569_v30 }
  0xbe   : > { %997 = vmatpush.msrb.mxu2 %v1575_v34 }
  0xc0   : > { %998 = vmatpush.msrb.mxu2 %v1582_v39 }
  0xc1   : > { %1246 = vmatmul.msk.f32.vlgmr.msrb.gmra.mxu2 %vm556_vm0, %v1464_v16 }
  0xc2   : > { %v619_v31 = vpop.f32.mrf.mxu0 }
  0xc3   : > { %v649_v59 = vmul.f32 %v619_v31, %v619_v31 }
  0xc9   : > { %1247 = vmatmul.msk.f32.gmra.mxu2 %vm556_vm0, %v1468_v17 }
  0xca   : > { %v622_v32 = vpop.f32.mrf.mxu0 }
  0xcb   : > { %v650_v51 = vmul.f32 %v622_v32, %v622_v32 }
  0xcd   : > { %v658_v56 = vadd.f32 %v650_v51, %v646_v52 }
  0xd1   : > { %1248 = vmatmul.msk.f32.gmra.mxu2 %vm556_vm0, %v1472_v18  ;;  %v792_v18 = vpop.f32.mrf.mxu2 }
  0xd2   : > { %v625_v33 = vpop.f32.mrf.mxu0 }
  0xd3   : > { %v651_v0 = vmul.f32 %v625_v33, %v625_v33 }
  0xd5   : > { %v659_v4 = vadd.f32 %v651_v0, %v647_v1  ;;  %v893_v0 = vld [vmem:[%s1725_s7 + $0x8] sm:$0xff] }
  0xd6   : > { %v942_v1 = vld [vmem:[%s1727_s9 + $0x8] sm:$0xff] }
  0xd9   : > { %1249 = vmatmul.msk.f32.gmra.mxu2 %vm556_vm0, %v1480_v20  ;;  %v894_v20 = vld [vmem:[%s1725_s7 + $0x10] sm:$0xff] }
  0xda   : > { %v628_v42 = vpop.f32.mrf.mxu0 }
  0xdb   : > { %v652_v45 = vmul.f32 %v628_v42, %v628_v42 }
  0xdd   : > { %v660_v49 = vadd.f32 %v652_v45, %v648_v47 }
  0xdf   : > { %v1550_v53 = vadd.f32 %v660_v49, %v656_v50 }
  0xe1   : > { %1300 = vrsqrt.f32 %v1550_v53  ;;  %vm697_vm5 = vcmp.eq.f32.partialorder %v1550_v53, inf  ;;  %vm699_vm6 = vcmp.eq.f32.partialorder %v1550_v53, 0.0  ;;  %1250 = vmatmul.msk.f32.gmra.mxu2 %vm556_vm0, %v1488_v22  ;;  %v943_v22 = vld [vmem:[%s1727_s9 + $0x10] sm:$0xff] }
  0xe2   : > { %v631_v46 = vpop.f32.mrf.mxu0 }
  0xe3   : > { %v653_v54 = vmul.f32 %v631_v46, %v631_v46 }
  0xe5   : > { %v661_v62 = vadd.f32 %v653_v54, %v649_v59 }
  0xe7   : > { %v1555_v2 = vadd.f32 %v661_v62, %v657_v63  ;;  %v1301_v6 = vpop.eup %1300  ;;  %v944_v63 = vld [vmem:[%s1727_s9 + $0x18] sm:$0xff] }
  0xe8   : > { %v691_v12 = vmul.f32 %v1301_v6, %v1550_v53  ;;  %961 = vmatpush.msra.mxu1 %v944_v63 }
  0xe9   : > { %vm709_vm7 = vcmp.eq.f32.partialorder %v1555_v2, inf  ;;  %vm711_vm8 = vcmp.eq.f32.partialorder %v1555_v2, 0.0  ;;  %1251 = vmatmul.msk.f32.gmra.mxu2 %vm556_vm0, %v1492_v23  ;;  %v1297_v23 = vld [vmem:[%s1724_s6] ss:$0 sm:$0xff] }
  0xea   : > { %v634_v55 = vpop.f32.mrf.mxu0  ;;  %v692_v28 = vmul.f32 %v1301_v6, %v691_v12  ;;  %962 = vmatpush.msra.mxu1 %v943_v22 }
  0xeb   : > { %v654_v58 = vmul.f32 %v634_v55, %v634_v55 }
  0xec   : > { %v693_v37 = vmul.f32 0.5, %v692_v28  ;;  %963 = vmatpush.msra.mxu1 %v942_v1 }
  0xed   : > { %v662_v61 = vadd.f32 %v658_v56, %v654_v58  ;;  %v700_v58 = vand.u32 2147483648, %v1550_v53 }
  0xee   : > { %v694_v45 = vsub.f32 1.5, %v693_v37 }
  0xef   : > { %1302 = vrsqrt.f32 %v662_v61  ;;  %vm673_vm1 = vcmp.eq.f32.partialorder %v662_v61, inf  ;;  %v676_v40 = vand.u32 2147483648, %v662_v61  ;;  %vm675_vm2 = vcmp.eq.f32.partialorder %v662_v61, 0.0 }
  0xf0   : > { %1304 = vrsqrt.f32 %v1555_v2  ;;  %v695_v49 = vmul.f32 %v1301_v6, %v694_v45  ;;  %v795_v6 = vpop.f32.mrf.mxu2 }
  0xf2   : > { %v637_v3 = vpop.f32.mrf.mxu0  ;;  %v696_v55 = vmul.f32 %v695_v49, %v1550_v53 }
  0xf3   : > { %v655_v5 = vmul.f32 %v637_v3, %v637_v3 }
  0xf4   : > { %v698_v16 = vsel %vm697_vm5, %v1550_v53, %v696_v55  ;;  %v895_v53 = vld [vmem:[%s1725_s7 + $0x18] sm:$0xff] }
  0xf5   : > { %v1303_v8 = vpop.eup %1302  ;;  %v663_v9 = vadd.f32 %v659_v4, %v655_v5  ;;  %v701_v59 = vsel %vm699_vm6, %v700_v58, %v698_v16  ;;  %924 = vmatpush.msra.mxu3 %v895_v53  ;;  %v892_v4 = vld [vmem:[%s1725_s7] sm:$0xff] }
  0xf6   : > { %v667_v10 = vmul.f32 %v1303_v8, %v662_v61  ;;  %v1305_v14 = vpop.eup %1304  ;;  %v941_v5 = vld [vmem:[%s1727_s9] sm:$0xff] }
  0xf7   : > { %1306 = vrsqrt.f32 %v663_v9  ;;  %v703_v38 = vmul.f32 %v1305_v14, %v1555_v2  ;;  %vm685_vm3 = vcmp.eq.f32.partialorder %v663_v9, inf  ;;  %v688_v51 = vand.u32 2147483648, %v663_v9  ;;  %925 = vmatpush.msra.mxu3 %v894_v20  ;;  %964 = vmatpush.msra.mxu1 %v941_v5 }
  0xf8   : > { %v668_v11 = vmul.f32 %v1303_v8, %v667_v10  ;;  %vm687_vm4 = vcmp.eq.f32.partialorder %v663_v9, 0.0  ;;  %v798_v12 = vpop.f32.mrf.mxu2 }
  0xf9   : > { %v704_v46 = vmul.f32 %v1305_v14, %v703_v38  ;;  %926 = vmatpush.msra.mxu3 %v893_v0 }
  0xfa   : > { %v669_v13 = vmul.f32 0.5, %v668_v11 }
  0xfb   : > { %v705_v50 = vmul.f32 0.5, %v704_v46  ;;  %927 = vmatpush.msra.mxu3 %v892_v4 }
  0xfc   : > { %v670_v15 = vsub.f32 1.5, %v669_v13 }
  0xfd   : > { %v1307_v31 = vpop.eup %1306  ;;  %v706_v56 = vsub.f32 1.5, %v705_v50  ;;  %1265 = vmatpush.msrb.mxu3 %v1564_v29 }
  0xfe   : > { %v671_v32 = vmul.f32 %v1303_v8, %v670_v15  ;;  %v679_v33 = vmul.f32 %v1307_v31, %v663_v9 }
  0xff   : > { %v707_v57 = vmul.f32 %v1305_v14, %v706_v56  ;;  %1266 = vmatpush.msrb.mxu3 %v1569_v30 }
 0x100   : > { %v672_v35 = vmul.f32 %v671_v32, %v662_v61  ;;  %v680_v36 = vmul.f32 %v1307_v31, %v679_v33 }
 0x101   : > { %v708_v60 = vmul.f32 %v707_v57, %v1555_v2  ;;  %1267 = vmatpush.msrb.mxu3 %v1575_v34 }
 0x102   : > { %v674_v41 = vsel %vm673_vm1, %v662_v61, %v672_v35  ;;  %v681_v42 = vmul.f32 0.5, %v680_v36  ;;  %v712_v61 = vand.u32 2147483648, %v1555_v2  ;;  %v801_v35 = vpop.f32.mrf.mxu2 }
 0x103   : > { %v677_v43 = vsel %vm675_vm2, %v676_v40, %v674_v41  ;;  %v710_v17 = vsel %vm709_vm7, %v1555_v2, %v708_v60  ;;  %1268 = vmatpush.msrb.mxu3 %v1582_v39 }
 0x104   : > { %1226 = vmatmul.msk.f32.vlgmr.msrb.gmra.mxu1 %vm556_vm0, %v677_v43  ;;  %v682_v44 = vsub.f32 1.5, %v681_v42  ;;  %v713_v62 = vsel %vm711_vm8, %v712_v61, %v710_v17 }
 0x106   : > { %v683_v47 = vmul.f32 %v1307_v31, %v682_v44 }
 0x108   : > { %v684_v48 = vmul.f32 %v683_v47, %v663_v9 }
 0x10a   : > { %v686_v52 = vsel %vm685_vm3, %v663_v9, %v684_v48 }
 0x10b   : > { %v689_v54 = vsel %vm687_vm4, %v688_v51, %v686_v52 }
 0x10c   : > { %1227 = vmatmul.msk.f32.gmra.mxu1 %vm556_vm0, %v689_v54 }
 0x114   : > { %1228 = vmatmul.msk.f32.gmra.mxu1 %vm556_vm0, %v701_v59 }
 0x11c   : > { %1229 = vmatmul.msk.f32.gmra.mxu1 %vm556_vm0, %v713_v62 }
 0x181   : > { %v751_v2 = vpop.f32.mrf.mxu1 }
 0x182   : > { %v793_v3 = vadd.f32 %v792_v18, %v751_v2 }
 0x184   : > { %v808_v7 = vadd.f32 %v1297_v23, %v793_v3 }
 0x186   : > { %v1234_v8 = vmul.f32 -1.442695, %v808_v7 }
 0x188   : > { %1308 = vpow2.f32 %v1234_v8 }
 0x189   : > { %v754_v9 = vpop.f32.mrf.mxu1 }
 0x18a   : > { %v796_v10 = vadd.f32 %v795_v6, %v754_v9 }
 0x18c   : > { %v809_v11 = vadd.f32 %v1297_v23, %v796_v10 }
 0x18e   : > { %v1309_v13 = vpop.eup %1308  ;;  %v1235_v14 = vmul.f32 -1.442695, %v809_v11 }
 0x18f   : > { %v824_v15 = vadd.f32 1.0, %v1309_v13 }
 0x190   : > { %1310 = vpow2.f32 %v1235_v14 }
 0x191   : > { %1312 = vrcp.f32 %v824_v15  ;;  %v757_v28 = vpop.f32.mrf.mxu1  ;;  %v839_v40 = vand.u32 2147483648, %v824_v15  ;;  %v837_v43 = vand.u32 2147483647, %v824_v15  ;;  %vm833_vm10 = vweird.f32 %v824_v15 }
 0x192   : > { %v799_v31 = vadd.f32 %v798_v12, %v757_v28 }
 0x193   : > { %v840_v49 = vor.u32 1.1754944e-38, %v839_v40  ;;  %vm838_vm12 = vcmp.eq.f32.partialorder %v837_v43, 8.507059e+37 }
 0x194   : > { %v1643_v29 = vadd.f32 %v1297_v23, %v799_v31  ;;  %v1000_v31 = vpop.f32.mrf.mxu2 }
 0x196   : > { %v1311_v32 = vpop.eup %1310  ;;  %v1236_v30 = vmul.f32 -1.442695, %v1643_v29 }
 0x197   : > { %v1313_v33 = vpop.eup %1312  ;;  %v825_v34 = vadd.f32 1.0, %v1311_v32 }
 0x198   : > { %1314 = vpow2.f32 %v1236_v30  ;;  %v829_v36 = vmul.f32 %v1313_v33, %v824_v15  ;;  %vm834_vm9 = vweird.f32 %v1313_v33 }
 0x199   : > { %1316 = vrcp.f32 %v825_v34  ;;  %v760_v37 = vpop.f32.mrf.mxu1  ;;  %vm835_vm11 = vmor %vm833_vm10, %vm834_vm9  ;;  %v854_v56 = vand.u32 2147483648, %v825_v34  ;;  %v852_v57 = vand.u32 2147483647, %v825_v34  ;;  %vm848_vm14 = vweird.f32 %v825_v34 }
 0x19a   : > { %v802_v38 = vadd.f32 %v801_v35, %v760_v37  ;;  %v830_v39 = vsub.f32 1.0, %v829_v36  ;;  %vm978_vm10 = vcmask 130048  }
 0x19b   : > { %v855_v61 = vor.u32 1.1754944e-38, %v854_v56  ;;  %vm853_vm1 = vcmp.eq.f32.partialorder %v852_v57, 8.507059e+37 }
 0x19c   : > { %v1646_v41 = vadd.f32 %v1297_v23, %v802_v38  ;;  %v831_v42 = vmul.f32 %v1313_v33, %v830_v39 }
 0x19e   : > { %v1315_v44 = vpop.eup %1314  ;;  %v1237_v45 = vmul.f32 -1.442695, %v1646_v41  ;;  %v832_v46 = vadd.f32 %v1313_v33, %v831_v42 }
 0x19f   : > { %v1317_v47 = vpop.eup %1316  ;;  %v826_v48 = vadd.f32 1.0, %v1315_v44 }
 0x1a0   : > { %1318 = vpow2.f32 %v1237_v45  ;;  %v836_v50 = vsel %vm835_vm11, %v1313_v33, %v832_v46  ;;  %v844_v51 = vmul.f32 %v1317_v47, %v825_v34  ;;  %vm849_vm13 = vweird.f32 %v1317_v47 }
 0x1a1   : > { %1320 = vrcp.f32 %v826_v48  ;;  %v841_v52 = vsel %vm838_vm12, %v840_v49, %v836_v50  ;;  %vm850_vm15 = vmor %vm848_vm14, %vm849_vm13  ;;  %v869_v22 = vand.u32 2147483648, %v826_v48  ;;  %v867_v0 = vand.u32 2147483647, %v826_v48 }
 0x1a2   : > { %v888_v54 = vmul.f32 %v841_v52, %v808_v7  ;;  %v845_v55 = vsub.f32 1.0, %v844_v51  ;;  %vm863_vm3 = vweird.f32 %v826_v48  ;;  %vm1088_vm11 = vcmask 392192  }
 0x1a3   : > { %v870_v3 = vor.u32 1.1754944e-38, %v869_v22  ;;  %vm868_vm5 = vcmp.eq.f32.partialorder %v867_v0, 8.507059e+37 }
 0x1a4   : > { %1238 = vmatmul.msk.f32.vlgmr.msra.gmra.mxu3 %vm556_vm0, %v888_v54  ;;  %1242 = vmatmul.msk.f32.vlgmr.msra.gmra.mxu1 %vm556_vm0, %v888_v54  ;;  %v846_v16 = vmul.f32 %v1317_v47, %v845_v55 }
 0x1a6   : > { %v1319_v58 = vpop.eup %1318  ;;  %v847_v59 = vadd.f32 %v1317_v47, %v846_v16 }
 0x1a7   : > { %v1321_v60 = vpop.eup %1320  ;;  %v827_v17 = vadd.f32 1.0, %v1319_v58 }
 0x1a8   : > { %v851_v62 = vsel %vm850_vm15, %v1317_v47, %v847_v59  ;;  %v859_v18 = vmul.f32 %v1321_v60, %v826_v48  ;;  %vm864_vm2 = vweird.f32 %v1321_v60 }
 0x1a9   : > { %1322 = vrcp.f32 %v827_v17  ;;  %v856_v53 = vsel %vm853_vm1, %v855_v61, %v851_v62  ;;  %vm865_vm4 = vmor %vm863_vm3, %vm864_vm2  ;;  %v884_v9 = vand.u32 2147483648, %v827_v17  ;;  %vm878_vm7 = vweird.f32 %v827_v17 }
 0x1aa   : > { %v889_v63 = vmul.f32 %v856_v53, %v809_v11  ;;  %v860_v20 = vsub.f32 1.0, %v859_v18  ;;  %v882_v11 = vand.u32 2147483647, %v827_v17 }
 0x1ab   : > { %v885_v13 = vor.u32 1.1754944e-38, %v884_v9 }
 0x1ac   : > { %1239 = vmatmul.msk.f32.gmra.mxu3 %vm556_vm0, %v889_v63  ;;  %1243 = vmatmul.msk.f32.gmra.mxu1 %vm556_vm0, %v889_v63  ;;  %v861_v23 = vmul.f32 %v1321_v60, %v860_v20  ;;  %vm883_vm9 = vcmp.eq.f32.partialorder %v882_v11, 8.507059e+37 }
 0x1ae   : > { %v862_v1 = vadd.f32 %v1321_v60, %v861_v23 }
 0x1af   : > { %v1323_v2 = vpop.eup %1322 }
 0x1b0   : > { %v866_v4 = vsel %vm865_vm4, %v1321_v60, %v862_v1  ;;  %v874_v5 = vmul.f32 %v1323_v2, %v827_v17  ;;  %vm879_vm6 = vweird.f32 %v1323_v2 }
 0x1b1   : > { %v871_v6 = vsel %vm868_vm5, %v870_v3, %v866_v4  ;;  %vm880_vm8 = vmor %vm878_vm7, %vm879_vm6 }
 0x1b2   : > { %v890_v7 = vmul.f32 %v871_v6, %v1643_v29  ;;  %v875_v8 = vsub.f32 1.0, %v874_v5  ;;  %v1003_v29 = vpop.f32.mrf.mxu2 }
 0x1b4   : > { %1240 = vmatmul.msk.f32.gmra.mxu3 %vm556_vm0, %v890_v7  ;;  %1244 = vmatmul.msk.f32.gmra.mxu1 %vm556_vm0, %v890_v7  ;;  %v876_v10 = vmul.f32 %v1323_v2, %v875_v8 }
 0x1b6   : > { %v877_v12 = vadd.f32 %v1323_v2, %v876_v10 }
 0x1b8   : > { %v881_v14 = vsel %vm880_vm8, %v1323_v2, %v877_v12 }
 0x1b9   : > { %v886_v15 = vsel %vm883_vm9, %v885_v13, %v881_v14 }
 0x1ba   : > { %v891_v28 = vmul.f32 %v886_v15, %v1646_v41  ;;  %v1671_v32 = vpop.f32.mrf.mxu2 }
 0x1bc   : > { %1241 = vmatmul.msk.f32.gmra.mxu3 %vm556_vm0, %v891_v28  ;;  %1245 = vmatmul.msk.f32.gmra.mxu1 %vm556_vm0, %v891_v28 }
 0x1c4   : > { %1252 = vmatmul.msk.f32.vlgmr.msrb.gmra.mxu3 %vm556_vm0, %v1496_v24  ;;  %v1009_v24 = vpop.f32.mrf.mxu2 }
 0x1cc   : > { %1253 = vmatmul.msk.f32.gmra.mxu3 %vm556_vm0, %v1500_v25  ;;  %v1298_v25 = vld [vmem:[%s1728_s10] ss:$0 sm:$0xff] }
 0x1d4   : > { %1254 = vmatmul.msk.f32.gmra.mxu3 %vm556_vm0, %v1504_v26  ;;  %v1012_v26 = vpop.f32.mrf.mxu2 }
 0x1dc   : > { %1255 = vmatmul.msk.f32.gmra.mxu3 %vm556_vm0, %v1508_v27  ;;  %v1015_v36 = vpop.f32.mrf.mxu2 }
 0x1e4   : > { %1256 = vmatmul.msk.f32.gmra.mxu3 %vm556_vm0, %v1476_v19  ;;  %v1299_v19 = vld [vmem:[%s1726_s8] ss:$0 sm:$0xff] }
 0x1ec   : > { %1257 = vmatmul.msk.f32.gmra.mxu3 %vm556_vm0, %v1484_v21 }
 0x221   : > { %v966_v30 = vpop.f32.mrf.mxu1 }
 0x222   : > { %v967_v33 = vadd.f32 %v1298_v25, %v966_v30 }
 0x224   : > { %v1040_v34 = vmul.f32 %v1012_v26, %v967_v33  ;;  %v1036_v18 = vmul.f32 %v1000_v31, %v967_v33 }
 0x226   : > { %1052 = vrot.lane.b32.xlu0 %v1040_v34, %s1348_s24 }
 0x227   : > { %v929_v21 = vpop.f32.mrf.mxu3 }
 0x228   : > { %v930_v27 = vadd.f32 %v1299_v19, %v929_v21 }
 0x229   : > { %v969_v35 = vpop.f32.mrf.mxu1 }
 0x22a   : > { %979 = vst.msk [vmem:[%s524_s14] sm:$0xff] %vm978_vm10, %v930_v27  ;;  %v970_v37 = vadd.f32 %v1298_v25, %v969_v35 }
 0x22c   : > { %v1041_v38 = vmul.f32 %v1015_v36, %v970_v37  ;;  %v1037_v63 = vmul.f32 %v1003_v29, %v970_v37 }
 0x22e   : > { %1054 = vrot.lane.b32.xlu0 %v1041_v38, %s1348_s24 }
 0x22f   : > { %v932_v39 = vpop.f32.mrf.mxu3 }
 0x230   : > { %v933_v40 = vadd.f32 %v1299_v19, %v932_v39 }
 0x231   : > { %v972_v41 = vpop.f32.mrf.mxu1 }
 0x232   : > { %980 = vst.msk [vmem:[%s524_s14 + $0x8] sm:$0xff] %vm978_vm10, %v933_v40  ;;  %v973_v49 = vadd.f32 %v1298_v25, %v972_v41 }
 0x234   : > { %v1038_v3 = vmul.f32 %v1671_v32, %v973_v49 }
 0x237   : > { %v935_v42 = vpop.f32.mrf.mxu3 }
 0x238   : > { %v936_v43 = vadd.f32 %v1299_v19, %v935_v42 }
 0x239   : > { %v975_v44 = vpop.f32.mrf.mxu1 }
 0x23a   : > { %981 = vst.msk [vmem:[%s524_s14 + $0x10] sm:$0xff] %vm978_vm10, %v936_v43  ;;  %v976_v45 = vadd.f32 %v1298_v25, %v975_v44 }
 0x23c   : > { %v1039_v46 = vmul.f32 %v1009_v24, %v976_v45 }
 0x23f   : > { %v938_v47 = vpop.f32.mrf.mxu3 }
 0x240   : > { %v939_v48 = vadd.f32 %v1299_v19, %v938_v47 }
 0x242   : > { %982 = vst.msk [vmem:[%s524_s14 + $0x18] sm:$0xff] %vm978_vm10, %v939_v48 }
 0x247   : > { %v1018_v50 = vpop.f32.mrf.mxu3 }
 0x248   : > { %v1042_v51 = vmul.f32 %v1018_v50, %v973_v49 }
 0x24a   : > { %1056 = vrot.lane.b32.xlu1 %v1042_v51, %s1348_s24 }
 0x24f   : > { %v1021_v52 = vpop.f32.mrf.mxu3 }
 0x250   : > { %v1043_v58 = vmul.f32 %v1021_v52, %v976_v45 }
 0x257   : > { %v1024_v54 = vpop.f32.mrf.mxu3 }
 0x258   : > { %v1044_v55 = vmul.f32 %v1024_v54, %v967_v33 }
 0x25a   : > { %1068 = vrot.lane.b32.xlu1 %v1044_v55, %s1349_s15 }
 0x25f   : > { %v1027_v56 = vpop.f32.mrf.mxu3 }
 0x260   : > { %v1045_v16 = vmul.f32 %v1027_v56, %v970_v37 }
 0x262   : > { %1070 = vrot.lane.b32.xlu2 %v1045_v16, %s1349_s15 }
 0x267   : > { %v1030_v57 = vpop.f32.mrf.mxu3 }
 0x268   : > { %v1046_v59 = vmul.f32 %v1030_v57, %v973_v49 }
 0x26a   : > { %1058 = vrot.lane.b32.xlu2 %v1043_v58, %s1348_s24  ;;  %1072 = vrot.lane.b32.xlu0 %v1046_v59, %s1349_s15 }
 0x26f   : > { %v1033_v60 = vpop.f32.mrf.mxu3 }
 0x270   : > { %v1047_v17 = vmul.f32 %v1033_v60, %v976_v45 }
 0x272   : > { %1074 = vrot.lane.b32.xlu1 %v1047_v17, %s1349_s15 }
 0x298   : > { %v1053_v61 = vpop.permute.xlu0 %1052 }
 0x299   : > { %v1080_v22 = vsel %vm978_vm10, %v1036_v18, %v1053_v61 }
 0x2a0   : > { %v1055_v53 = vpop.permute.xlu0 %1054 }
 0x2a1   : > { %v1081_v0 = vsel %vm978_vm10, %v1037_v63, %v1055_v53 }
 0x2bc   : > { %v1057_v62 = vpop.permute.xlu1 %1056  ;;  %v1071_v20 = vpop.permute.xlu2 %1070 }
 0x2bd   : > { %v1085_v2 = vsel %vm556_vm0, %v1081_v0, %v1071_v20  ;;  %v1082_v4 = vsel %vm978_vm10, %v1038_v3, %v1057_v62 }
 0x2be   : > { %1090 = vst.msk [vmem:[%s530_s18 + $0x8] sm:$0xff] %vm1088_vm11, %v1085_v2 }
 0x2c4   : > { %v1059_v7 = vpop.permute.xlu2 %1058 }
 0x2c5   : > { %v1083_v8 = vsel %vm978_vm10, %v1039_v46, %v1059_v7 }
 0x2cc   : > { %v1069_v23 = vpop.permute.xlu1 %1068 }
 0x2cd   : > { %v1084_v1 = vsel %vm556_vm0, %v1080_v22, %v1069_v23 }
 0x2ce   : > { %1089 = vst.msk [vmem:[%s530_s18] sm:$0xff] %vm1088_vm11, %v1084_v1 }
 0x2dc   : > { %v1073_v5 = vpop.permute.xlu0 %1072 }
 0x2dd   : > { %v1086_v6 = vsel %vm556_vm0, %v1082_v4, %v1073_v5 }
 0x2de   : > { %1091 = vst.msk [vmem:[%s530_s18 + $0x10] sm:$0xff] %vm1088_vm11, %v1086_v6 }
 0x2e4   : > { %v1075_v9 = vpop.permute.xlu1 %1074 }
 0x2e5   : > { %v1087_v10 = vsel %vm556_vm0, %v1083_v8, %v1075_v9 }
 0x2e6   : > { %1092 = vst.msk [vmem:[%s530_s18 + $0x18] sm:$0xff] %vm1088_vm11, %v1087_v10 }
 0x2e7 PF: > { %p20_p9 = scmp.ge.s32.totalorder %s1432_s25, 4   ;;  %s1731_s21 = smov %s1342_s22 }
 0x2e8   : > { %s1732_s22 = smov %s1441_s28  ;;  %s1733_s23 = smov %s1432_s25 }
 0x2e9   :  { %22 = sbr.rel (!%p20_p9) target bundleno = 2 (0x2), region = 152 }

</bundles_post_ra>
